<compile_context>
chip_gen: v7x
topology: tpu7x:2x2x1
jax: 0.10.0
libtpu: 0.0.40
codegen_flags: <defaults>
</compile_context>

<pallas_src>
import jax
import jax.numpy as jnp
from jax.experimental import pallas as pl
from jax.experimental.pallas import tpu as pltpu

_LANE = 128


def _round_up(x, m):
    return (x + m - 1) // m * m


def _pad2d(a, rows, cols):
    return jnp.pad(a, ((0, rows - a.shape[0]), (0, cols - a.shape[1])))


def _vmem_limit_bytes():
    """Generation-aware VMEM budget: ~102 MiB on v5e/v6e, ~51 MiB on v7x."""
    try:
        cap = int(pltpu.get_tpu_info().vmem_capacity_bytes)
        if cap > 0:
            return int(cap * 0.80)
    except Exception:
        pass
    return 48 * 1024 * 1024  # conservative fallback; fits v7x's 64 MiB physical


# ---------------------------------------------------------------------------
# Tile geometry: decouple n_pad from the tile sizes (bounded padding inflation,
# large tiles that divide n_pad exactly, >= 2 row tiles when possible for v7x).
# ---------------------------------------------------------------------------
def _largest_tile(n_pad, target):
    t = max(_LANE, min(_round_up(target, _LANE), n_pad))
    for cand in range(t, _LANE - 1, -_LANE):
        if n_pad % cand == 0:
            return cand
    return _LANE


def _tiles_for(n_pad, tm_target, tk_target):
    tm = _largest_tile(n_pad, tm_target)
    if n_pad // tm < 2 and n_pad >= 2 * _LANE:
        # keep >= 2 row tiles so both v7x TensorCores stay busy
        tm = _largest_tile(n_pad, max(_LANE, n_pad // 2))
    tk = _largest_tile(n_pad, tk_target)
    return tm, tk


def _choose_geometry(n, tm_target, tk_target):
    """Pick (n_pad, tm, tk): small multiple-of-128 padding of n whose divisor
    structure allows big tiles (crude cost model: int8 adjacency bytes +
    ~0.35us fixed per-grid-step overhead expressed in equivalent bytes)."""
    best = None
    for align in (128, 256, 512, 1024, 2048):
        n_pad = _round_up(max(n, 1), align)
        tm, tk = _tiles_for(n_pad, tm_target, tk_target)
        steps = (n_pad // tm) * (n_pad // tk)
        cost = float(n_pad) * float(n_pad) + 400_000.0 * steps
        if best is None or cost < best[0]:
            best = (cost, n_pad, tm, tk)
    return best[1], best[2], best[3]


# ---------------------------------------------------------------------------
# One-time (per graph) adjacency preparation — hoist this out of the forward.
# ---------------------------------------------------------------------------
def prepare_adjacency(adj_norm, *, tm_target=512, tk_target=2048,
                      mask_dtype=jnp.int8):
    """Exact int8 0/1 mask + f32 per-row mean scale, zero-padded to n_pad.

    Assumes adj_norm is a row-mean-normalized 0/1 adjacency (all nonzeros in a
    row are equal to 1/deg), i.e. exactly the AdjSAGE / SAGEConv mean-aggr case.
    Streaming the int8 mask halves the O(N^2) HBM bytes vs bf16 and keeps the
    normalization exact (the f32 scale is applied in the kernel epilogue).
    """
    n = adj_norm.shape[0]
    n_pad, _, _ = _choose_geometry(n, tm_target, tk_target)
    mask = (adj_norm > 0).astype(mask_dtype)
    inv_deg = jnp.max(adj_norm, axis=1).astype(jnp.float32)  # 1/deg (0 if isolated)
    mask_pad = _pad2d(mask, n_pad, n_pad)
    inv_deg_pad = jnp.pad(inv_deg, (0, n_pad - n)).reshape(n_pad, 1)
    return mask_pad, inv_deg_pad


# ---------------------------------------------------------------------------
# Kernel 1 (small, per-layer precompute):
#   xw   = x @ W_l            (bf16 out, streamed / resident in kernel 2)
#   root = x @ W_r + b        (f32 out)
# ---------------------------------------------------------------------------
def _precompute_kernel(x_ref, wl_ref, wr_ref, b_ref, xw_ref, root_ref):
    x = x_ref[...].astype(wl_ref.dtype)  # bf16 inputs: full-rate MXU, f32 accum
    xw = jnp.dot(x, wl_ref[...], preferred_element_type=jnp.float32)
    root = jnp.dot(x, wr_ref[...], preferred_element_type=jnp.float32) + b_ref[...]
    xw_ref[...] = xw.astype(xw_ref.dtype)
    root_ref[...] = root.astype(root_ref.dtype)


def _precompute(x_pad, wl_pad, wr_pad, b_pad, *, tm, compute_dtype, vmem_limit):
    n_pad, fin_pad = x_pad.shape
    fout_pad = wl_pad.shape[1]

    grid_spec = pltpu.PrefetchScalarGridSpec(
        num_scalar_prefetch=0,
        grid=(n_pad // tm,),
        in_specs=[
            pl.BlockSpec((tm, fin_pad), lambda i: (i, 0)),        # x row tile
            pl.BlockSpec((fin_pad, fout_pad), lambda i: (0, 0)),  # W_l (invariant)
            pl.BlockSpec((fin_pad, fout_pad), lambda i: (0, 0)),  # W_r (invariant)
            pl.BlockSpec((1, fout_pad), lambda i: (0, 0)),        # bias
        ],
        out_specs=[
            pl.BlockSpec((tm, fout_pad), lambda i: (i, 0)),       # xw
            pl.BlockSpec((tm, fout_pad), lambda i: (i, 0)),       # root
        ],
    )
    return pl.pallas_call(
        _precompute_kernel,
        out_shape=(
            jax.ShapeDtypeStruct((n_pad, fout_pad), compute_dtype),
            jax.ShapeDtypeStruct((n_pad, fout_pad), jnp.float32),
        ),
        grid_spec=grid_spec,
        compiler_params=pltpu.CompilerParams(
            dimension_semantics=("parallel",),
            vmem_limit_bytes=vmem_limit,
        ),
    )(x_pad, wl_pad, wr_pad, b_pad)


# ---------------------------------------------------------------------------
# Kernel 2 (heavy, K-tiled aggregation over the int8 adjacency mask):
#   out = activation( inv_deg * (mask @ xw) + root )
# ---------------------------------------------------------------------------
def _make_agg_kernel(fout, tk, apply_relu, apply_log_softmax, xw_resident):
    def kernel(adj_ref, xw_ref, root_ref, invdeg_ref, o_ref, acc_ref):
        k = pl.program_id(1)

        @pl.when(k == 0)
        def _():
            acc_ref[...] = jnp.zeros_like(acc_ref)

        adj = adj_ref[...].astype(jnp.bfloat16)  # exact 0/1 mask; int8 in HBM
        if xw_resident:
            off = pl.multiple_of(k * tk, tk)
            xw = xw_ref[pl.ds(off, tk), :]
        else:
            xw = xw_ref[...]
        acc_ref[...] += jnp.dot(adj, xw, preferred_element_type=jnp.float32)

        @pl.when(k == pl.num_programs(1) - 1)
        def _():
            # exact f32 per-row mean scale, then the root/self term
            h = acc_ref[...] * invdeg_ref[...] + root_ref[...]
            if apply_relu:
                h = jnp.maximum(h, 0.0)
            if apply_log_softmax:
                # mask padded lanes (exactly zero) out of the softmax
                lane = jax.lax.broadcasted_iota(jnp.int32, h.shape, 1)
                h = jnp.where(lane < fout, h, -1e30)
                m = jnp.max(h, axis=-1, keepdims=True)
                e = jnp.exp(h - m)
                h = (h - m) - jnp.log(jnp.sum(e, axis=-1, keepdims=True))
            o_ref[...] = h.astype(o_ref.dtype)

    return kernel


def _aggregate(adj_mask, inv_deg, xw, root, fout, *, apply_relu,
               apply_log_softmax, tm, tk, vmem_limit, xw_resident=None):
    n_pad = adj_mask.shape[0]
    fout_pad = xw.shape[1]
    adj_b = jnp.dtype(adj_mask.dtype).itemsize
    xw_b = jnp.dtype(xw.dtype).itemsize

    # VMEM footprint (double-buffered inputs/outputs + f32 accumulator)
    fixed = (2 * tm * tk * adj_b            # adjacency tiles
             + 2 * tm * fout_pad * 4        # root
             + 2 * tm * _LANE * 4           # inv_deg (lane-padded)
             + 2 * tm * fout_pad * 4        # output
             + tm * fout_pad * 4)           # accumulator
    if xw_resident is None:
        xw_resident = fixed + 2 * n_pad * fout_pad * xw_b <= int(vmem_limit * 0.9)

    if xw_resident:
        # grid-invariant spec: fetched from HBM once, then read from VMEM
        xw_spec = pl.BlockSpec((n_pad, fout_pad), lambda i, k: (0, 0))
        xw_traffic = n_pad * fout_pad * xw_b
    else:
        xw_spec = pl.BlockSpec((tk, fout_pad), lambda i, k: (k, 0))
        xw_traffic = (n_pad // tm) * n_pad * fout_pad * xw_b

    kernel = _make_agg_kernel(fout, tk, apply_relu, apply_log_softmax, xw_resident)

    cost = pl.CostEstimate(
        flops=2 * n_pad * n_pad * fout_pad,
        transcendentals=(n_pad * (fout_pad + 1)) if apply_log_softmax else 0,
        bytes_accessed=(n_pad * n_pad * adj_b + xw_traffic
                        + 2 * n_pad * fout_pad * 4 + n_pad * 4),
    )

    grid_spec = pltpu.PrefetchScalarGridSpec(
        num_scalar_prefetch=0,
        grid=(n_pad // tm, n_pad // tk),
        in_specs=[
            pl.BlockSpec((tm, tk), lambda i, k: (i, k)),        # int8 mask tile
            xw_spec,                                            # messages x@W_l
            pl.BlockSpec((tm, fout_pad), lambda i, k: (i, 0)),  # root x@W_r + b
            pl.BlockSpec((tm, 1), lambda i, k: (i, 0)),         # per-row 1/deg
        ],
        out_specs=pl.BlockSpec((tm, fout_pad), lambda i, k: (i, 0)),
        scratch_shapes=[pltpu.VMEM((tm, fout_pad), jnp.float32)],
    )

    return pl.pallas_call(
        kernel,
        out_shape=jax.ShapeDtypeStruct((n_pad, fout_pad), jnp.float32),
        grid_spec=grid_spec,
        compiler_params=pltpu.CompilerParams(
            dimension_semantics=("parallel", "arbitrary"),
            vmem_limit_bytes=vmem_limit,
        ),
        cost_estimate=cost,
    )(adj_mask, xw, root, inv_deg)


# ---------------------------------------------------------------------------
# Parameters + forward
# ---------------------------------------------------------------------------
def init_adj_sage_params(key, in_channels, hidden_channels, out_channels,
                         num_layers):
    """Deterministic SAGEConv parameter stack. Each layer: (W_l, W_r, b_l).
    Weights stored as (F_in, F_out) = W^T of torch.nn.Linear."""
    fins = [in_channels] + [hidden_channels] * (num_layers - 1)
    fouts = [hidden_channels] * (num_layers - 1) + [out_channels]
    params = []
    for fin, fout in zip(fins, fouts):
        k1, k2, key = jax.random.split(key, 3)
        scale = 1.0 / jnp.sqrt(jnp.float32(fin))
        w_l = jax.random.uniform(k1, (fin, fout), jnp.float32, -scale, scale)
        w_r = jax.random.uniform(k2, (fin, fout), jnp.float32, -scale, scale)
        b = jnp.zeros((fout,), jnp.float32)
        params.append((w_l, w_r, b))
    return params


def adj_sage_forward(x, adj_norm, params, *, prepared=None, tm=512, tk=2048,
                     xw_resident=None, compute_dtype=jnp.bfloat16):
    """AdjSAGE.forward (eval mode: dropout is identity).

    For a static graph pass `prepared=prepare_adjacency(adj_norm, ...)` so the
    O(N^2) mask extraction / padding is paid once, not per call.

    TODO(synk): training-mode dropout (F.dropout with training=True) is not
    implemented; this reproduces eval-mode semantics.
    """
    n = x.shape[0]
    n_classes = params[-1][0].shape[1]
    vmem_limit = _vmem_limit_bytes()

    if prepared is None:
        prepared = prepare_adjacency(adj_norm, tm_target=tm, tk_target=tk)
    adj_mask, inv_deg = prepared
    n_pad = adj_mask.shape[0]
    assert n_pad % _LANE == 0 and n_pad >= n
    tm_eff, tk_eff = _tiles_for(n_pad, tm, tk)

    fin0 = params[0][0].shape[0]
    h = _pad2d(x.astype(jnp.float32), n_pad, _round_up(fin0, _LANE))

    n_layers = len(params)
    for li, (w_l, w_r, b) in enumerate(params):
        fin, fout = w_l.shape
        fin_pad = _round_up(fin, _LANE)
        fout_pad = _round_up(fout, _LANE)
        assert h.shape == (n_pad, fin_pad)

        wl_pad = _pad2d(w_l, fin_pad, fout_pad).astype(compute_dtype)
        wr_pad = _pad2d(w_r, fin_pad, fout_pad).astype(compute_dtype)
        b_pad = _pad2d(b.reshape(1, fout).astype(jnp.float32), 1, fout_pad)

        xw, root = _precompute(h, wl_pad, wr_pad, b_pad, tm=tm_eff,
                               compute_dtype=compute_dtype, vmem_limit=vmem_limit)
        last = li == n_layers - 1
        h = _aggregate(adj_mask, inv_deg, xw, root, fout,
                       apply_relu=not last, apply_log_softmax=last,
                       tm=tm_eff, tk=tk_eff, vmem_limit=vmem_limit,
                       xw_resident=xw_resident)

    return h[:n, :n_classes]


# ---------------------------------------------------------------------------
# References for sanity checking
# ---------------------------------------------------------------------------
def _reference_forward_f32(x, adj_norm, params):
    """Pure-f32 reference with the original association (PyTorch semantics)."""
    h = x
    n_layers = len(params)
    for li, (w_l, w_r, b) in enumerate(params):
        out = (adj_norm @ h) @ w_l + b + h @ w_r
        h = jax.nn.relu(out) if li < n_layers - 1 else jax.nn.log_softmax(out, axis=-1)
    return h


def _reference_forward_emulated(x, adj_norm, params):
    """Same arithmetic as the kernels (int8 mask + f32 scale, bf16 operands,
    f32 accumulation), expressed in plain XLA."""
    mask = (adj_norm > 0).astype(jnp.bfloat16)
    inv_deg = jnp.max(adj_norm, axis=1, keepdims=True)
    h = x
    n_layers = len(params)
    for li, (w_l, w_r, b) in enumerate(params):
        hb = h.astype(jnp.bfloat16)
        xw = jnp.dot(hb, w_l.astype(jnp.bfloat16),
                     preferred_element_type=jnp.float32).astype(jnp.bfloat16)
        root = jnp.dot(hb, w_r.astype(jnp.bfloat16),
                       preferred_element_type=jnp.float32) + b
        agg = jnp.dot(mask, xw, preferred_element_type=jnp.float32)
        out = agg * inv_deg + root
        h = jax.nn.relu(out) if li < n_layers - 1 else jax.nn.log_softmax(out, axis=-1)
    return h


if __name__ == "__main__":
    key = jax.random.PRNGKey(0)

    # Small synthetic graph; sizes deliberately NOT multiples of 128 to
    # exercise the padding / geometry-selection path.
    N = 500
    in_channels = 48
    hidden_channels = 96
    out_channels = 40
    num_layers = 3
    # dropout = 0.5  (identity in eval mode)

    kx, ka, kp = jax.random.split(key, 3)

    x = jax.random.normal(kx, (N, in_channels), jnp.float32)

    # Random symmetric adjacency (no self loops), row-normalized (mean aggr).
    a_rand = jax.random.uniform(ka, (N, N))
    adj = (a_rand < 0.05).astype(jnp.float32)
    adj = jnp.maximum(adj, adj.T)
    adj = adj * (1.0 - jnp.eye(N, dtype=jnp.float32))
    deg = jnp.sum(adj, axis=1, keepdims=True)
    adj_norm = adj / jnp.maximum(deg, 1.0)

    params = init_adj_sage_params(kp, in_channels, hidden_channels,
                                  out_channels, num_layers)

    # Hoist the O(N^2) mask extraction / cast / pad out of the per-call path.
    prepared = prepare_adjacency(adj_norm)

    # Default (large-tile, auto resident-xw) path.
    out = adj_sage_forward(x, adj_norm, params, prepared=prepared)
    out = jax.block_until_ready(out)
    assert out.shape == (N, out_channels)

    # Tight check: the kernels' own arithmetic reproduced in plain XLA.
    ref_emu = _reference_forward_emulated(x, adj_norm, params)
    assert jnp.allclose(out, ref_emu, atol=2e-2, rtol=2e-2), \
        float(jnp.max(jnp.abs(out - ref_emu)))

    # Also exercise the streamed-xw fallback path (used when xw exceeds VMEM).
    out_stream = adj_sage_forward(x, adj_norm, params, prepared=prepared,
                                  xw_resident=False)
    out_stream = jax.block_until_ready(out_stream)
    assert jnp.allclose(out_stream, ref_emu, atol=2e-2, rtol=2e-2), \
        float(jnp.max(jnp.abs(out_stream - ref_emu)))

    # Loose check: full-f32 reference with the original association.
    ref_f32 = _reference_forward_f32(x, adj_norm, params)
    assert jnp.allclose(out, ref_f32, atol=6e-2, rtol=6e-2), \
        float(jnp.max(jnp.abs(out - ref_f32)))

    print("KERNEL_OK")
</pallas_src>

<mosaic_0001>
module attributes {stable_mosaic.version = 11 : i64} {
  func.func @_precompute_kernel(%arg0: i32, %arg1: memref<256x128xf32, #tpu.memory_space<vmem>>, %arg2: memref<128x128xbf16, #tpu.memory_space<vmem>>, %arg3: memref<128x128xbf16, #tpu.memory_space<vmem>>, %arg4: memref<1x128xf32, #tpu.memory_space<vmem>>, %arg5: memref<256x128xbf16, #tpu.memory_space<vmem>>, %arg6: memref<256x128xf32, #tpu.memory_space<vmem>>) attributes {dimension_semantics = [#tpu.dimension_semantics<parallel>], iteration_bounds = array<i64: 2>, scalar_prefetch = 0 : i64, scratch_operands = 0 : i64, tpu.core_type = #tpu.core_type<tc>, window_params = [{transform_indices = @transform_0, window_bounds = array<i64: 256, 128>}, {pipeline_mode = #tpu.pipeline_mode<synchronous>, transform_indices = @transform_1, window_bounds = array<i64: 128, 128>}, {pipeline_mode = #tpu.pipeline_mode<synchronous>, transform_indices = @transform_2, window_bounds = array<i64: 128, 128>}, {pipeline_mode = #tpu.pipeline_mode<synchronous>, transform_indices = @transform_3, window_bounds = array<i64: 1, 128>}, {transform_indices = @transform_4, window_bounds = array<i64: 256, 128>}, {transform_indices = @transform_5, window_bounds = array<i64: 256, 128>}]} {
    %c0 = arith.constant 0 : index
    %c0_0 = arith.constant 0 : index
    %0 = vector.load %arg1[%c0, %c0_0] : memref<256x128xf32, #tpu.memory_space<vmem>>, vector<256x128xf32>
    %1 = arith.truncf %0 : vector<256x128xf32> to vector<256x128xbf16>
    %c0_1 = arith.constant 0 : index
    %c0_2 = arith.constant 0 : index
    %2 = vector.load %arg2[%c0_1, %c0_2] : memref<128x128xbf16, #tpu.memory_space<vmem>>, vector<128x128xbf16>
    %cst = arith.constant dense<0.000000e+00> : vector<256x128xf32>
    %3 = tpu.matmul %1, %2, %cst {dimension_numbers = #tpu.dot_dimension_numbers<[1], [0], [0], [1], [0, 0, 1, 1], [], []>} : vector<256x128xbf16>, vector<128x128xbf16>, vector<256x128xf32> -> vector<256x128xf32>
    %c0_3 = arith.constant 0 : index
    %c0_4 = arith.constant 0 : index
    %4 = vector.load %arg3[%c0_3, %c0_4] : memref<128x128xbf16, #tpu.memory_space<vmem>>, vector<128x128xbf16>
    %cst_5 = arith.constant dense<0.000000e+00> : vector<256x128xf32>
    %5 = tpu.matmul %1, %4, %cst_5 {dimension_numbers = #tpu.dot_dimension_numbers<[1], [0], [0], [1], [0, 0, 1, 1], [], []>} : vector<256x128xbf16>, vector<128x128xbf16>, vector<256x128xf32> -> vector<256x128xf32>
    %c0_6 = arith.constant 0 : index
    %c0_7 = arith.constant 0 : index
    %6 = vector.load %arg4[%c0_6, %c0_7] : memref<1x128xf32, #tpu.memory_space<vmem>>, vector<1x128xf32>
    %7 = vector.broadcast %6 : vector<1x128xf32> to vector<256x128xf32>
    %8 = arith.addf %5, %7 : vector<256x128xf32>
    %9 = arith.truncf %3 : vector<256x128xf32> to vector<256x128xbf16>
    %c0_8 = arith.constant 0 : index
    %c0_9 = arith.constant 0 : index
    %10 = vector.load %arg5[%c0_8, %c0_9] : memref<256x128xbf16, #tpu.memory_space<vmem>>, vector<256x128xbf16>
    tpu.vector_store %arg5[%c0_8, %c0_9], %9 {strides = array<i32>} : memref<256x128xbf16, #tpu.memory_space<vmem>>, vector<256x128xbf16>,
    %c0_10 = arith.constant 0 : index
    %c0_11 = arith.constant 0 : index
    %11 = vector.load %arg6[%c0_10, %c0_11] : memref<256x128xf32, #tpu.memory_space<vmem>>, vector<256x128xf32>
    tpu.vector_store %arg6[%c0_10, %c0_11], %8 {strides = array<i32>} : memref<256x128xf32, #tpu.memory_space<vmem>>, vector<256x128xf32>,
    return
  }
  func.func @transform_0(%arg0: i32) -> (i32, i32) {
    %c0_i32 = arith.constant 0 : i32
    %c0_i32_0 = arith.constant 0 : i32
    return %arg0, %c0_i32 : i32, i32
  }
  func.func @transform_1(%arg0: i32) -> (i32, i32) {
    %c0_i32 = arith.constant 0 : i32
    %c0_i32_0 = arith.constant 0 : i32
    %c0_i32_1 = arith.constant 0 : i32
    return %c0_i32, %c0_i32_0 : i32, i32
  }
  func.func @transform_2(%arg0: i32) -> (i32, i32) {
    %c0_i32 = arith.constant 0 : i32
    %c0_i32_0 = arith.constant 0 : i32
    %c0_i32_1 = arith.constant 0 : i32
    return %c0_i32, %c0_i32_0 : i32, i32
  }
  func.func @transform_3(%arg0: i32) -> (i32, i32) {
    %c0_i32 = arith.constant 0 : i32
    %c0_i32_0 = arith.constant 0 : i32
    %c0_i32_1 = arith.constant 0 : i32
    return %c0_i32, %c0_i32_0 : i32, i32
  }
  func.func @transform_4(%arg0: i32) -> (i32, i32) {
    %c0_i32 = arith.constant 0 : i32
    %c0_i32_0 = arith.constant 0 : i32
    return %arg0, %c0_i32 : i32, i32
  }
  func.func @transform_5(%arg0: i32) -> (i32, i32) {
    %c0_i32 = arith.constant 0 : i32
    %c0_i32_0 = arith.constant 0 : i32
    return %arg0, %c0_i32 : i32, i32
  }
}

</mosaic_0001>

<bundles_post_ra>
// kernel: tpu_custom_call.1
= control target key start
LH: loop header
LB: loop body
LE: loop exit
PB: predicated region body
PF: predicated region fallthrough
CT: control target
= control target key end

     0   :  { %11 = vsyncpa [#allocation3], 0  ;;  %s2213_s0 = inlined_call_operand.hbm [shape: f32[512,128], index: 0, kind: input, shape index: {}]   ;;  %s2214_s1 = inlined_call_operand.hbm [shape: bf16[128,128], index: 1, kind: input, shape index: {}]   ;;  %s2215_s2 = inlined_call_operand.hbm [shape: bf16[128,128], index: 2, kind: input, shape index: {}]   ;;  %s2216_s3 = inlined_call_operand.vmem [shape: f32[1,128], index: 3, kind: input, shape index: {}]   ;;  %s2217_s4 = inlined_call_operand.hbm [shape: bf16[512,128], index: 4, kind: output, shape index: {0}]   ;;  %s2218_s5 = inlined_call_operand.hbm [shape: f32[512,128], index: 5, kind: output, shape index: {1}]  }
   0x1   :  { %13 = vsyncpa [#allocation3 + $0x1], 0 }
   0x2   :  { %14 = vsyncpa [#allocation6], 0 }
   0x3   :  { %15 = vsyncpa [#allocation4], 0 }
   0x4   :  { %17 = vsyncpa [#allocation4 + $0x1], 0 }
   0x5   :  { %18 = vsyncpa [#allocation10], 0 }
   0x6   :  { %20 = vsyncpa [#allocation10 + $0x1], 0  ;;  %s1817_s18 = smov 0   ;;  %s1819_s19 = smov 0  }
   0x7   :  { %s1821_s20 = smov 0   ;;  %s1823_s21 = smov 0  }
   0x8 LB: > { %s1838_s22 = sadd.s32 4294967295, %s1772_s21   ;;  %s1143_s23 = sadd.s32 4294967294, %s1772_s21   ;;  %s1772_s21 = sphi %s1823_s21, %s2238_s21   ;;  %s1768_s20 = sphi %s1821_s20, %s2237_s20   ;;  %s1764_s19 = sphi %s1819_s19, %s2236_s19   ;;  %s1760_s18 = sphi %s1817_s18, %s2235_s18  }
   0x9   : > { %p46_p0 = scmp.ne.s32.totalorder %s1764_s19, %s1760_s18  ;;  %p2219_p1 = scmp.eq.s32.totalorder %s1838_s22, 0 }
   0xa   : > { %p139_p3 = scmp.eq.s32.totalorder %s1143_s23, 1  ;;  %p1144_p5 = scmp.ge.s32.totalorder %s1772_s21, 1 }
   0xb   : > { %p1847_p4 = por %p2219_p1, %p46_p0  ;;  %p172_p7 = scmp.lt.s32.totalorder %s1772_s21, 3 }
   0xc   : > { %p1852_p6 = por %p139_p3, %p46_p0  ;;  %s1774_s27 = smov [#allocation5]  }
   0xd   : > { %s2222_s24 = scalar_select %p1847_p4, 1, 0 }
   0xe   : > { %s2223_s25 = scalar_select %p1852_p6, 1, 0 }
   0xf   : > { %p1857_p8 = pnand %p1144_p5, %p172_p7  ;;  %s184_s28 = sshll.u32 %s1774_s27, 4  ;;  %s1861_s28 = int_to_ptr.vmem [resolvable:$true] %s184_s28 }
  0x10   : > { %s1775_s30 = smov [#allocation7]   ;;  %s1584_s9 = scalar_lea.hbm %s2214_s1, 1024 }
  0x11   : > { %p1502_p9 = pneg %p1857_p8  ;;  %s197_s6 = sshll.u32 %s1775_s30, 4  ;;  %s1872_s6 = int_to_ptr.vmem [resolvable:$true] %s197_s6 }
  0x12   : > { %p1585_p12 = scmp.ne.s32.totalorder %s2214_s1, %s1584_s9  ;;  %p1591_p5 = scmp.lt.u32.totalorder %s1584_s9, %s2214_s1 }
  0x13   : > { %p1868_p11 = pnand %p1502_p9, %p2219_p1 }
  0x15   : > { %p1586_p13 = pneg %p1868_p11 }
  0x17   : > { %p1587_p0 = pnand %p1586_p13, %p1585_p12 }
  0x19   : > { %p1588_p3 = pneg %p1587_p0 }
  0x1b   : > { %p1593_p7 = pnand %p1591_p5, %p1588_p3 }
  0x1d   : > { %1596 = shalt.err (!%p1593_p7)
}
  0x1e   : > { %s1597_s14 = scalar_lea.vmem %s1861_s28, 1024  ;;  %p1605_p2 = scmp.lt.s32.totalorder %s1861_s28, %s1861_s28 }
  0x1f   : > { %p1598_p9 = scmp.ne.s32.totalorder %s1861_s28, %s1597_s14  ;;  %p1606_p12 = scmp.lt.s32.totalorder %s1597_s14, %s1597_s14 }
  0x21   : > { %p1600_p10 = pnand %p1598_p9, %p1586_p13  ;;  %p1607_p0 = por %p1606_p12, %p1605_p2 }
  0x23   : > { %p1601_p1 = pneg %p1600_p10 }
  0x25   : > { %p1608_p6 = pnand %p1607_p0, %p1601_p1 }
  0x27   : > { %1611 = shalt.err (!%p1608_p6)
}
  0x28   : > { %s1776_s15 = smov 64   ;;  %s1777_s16 = smov 4  }
  0x29   : > { %1505 = dma.hbm_to_vmem [thread:$0]  (!%p1868_p11), %s2214_s1, 1024, %s1861_s28, [#allocation6], %s1776_s15, %s1776_s15, %s1777_s16  }
  0x2a   : > { %s1612_s7 = scalar_lea.hbm %s2215_s2, 1024 }
  0x2b   : > { %p1613_p2 = scmp.ne.s32.totalorder %s2215_s2, %s1612_s7  ;;  %p1619_p10 = scmp.lt.u32.totalorder %s1612_s7, %s2215_s2 }
  0x2d   : > { %p1615_p1 = pnand %p1613_p2, %p1586_p13 }
  0x2f   : > { %p1616_p6 = pneg %p1615_p1 }
  0x31   : > { %p1621_p3 = pnand %p1619_p10, %p1616_p6 }
  0x33   : > { %1624 = shalt.err (!%p1621_p3)
}
  0x34   : > { %s1625_s28 = scalar_lea.vmem %s1872_s6, 1024  ;;  %p1633_p12 = scmp.lt.s32.totalorder %s1872_s6, %s1872_s6 }
  0x35   : > { %p1626_p5 = scmp.ne.s32.totalorder %s1872_s6, %s1625_s28  ;;  %p1634_p0 = scmp.lt.s32.totalorder %s1625_s28, %s1625_s28 }
  0x37   : > { %p1628_p7 = pnand %p1626_p5, %p1586_p13  ;;  %p1635_p2 = por %p1634_p0, %p1633_p12 }
  0x39   : > { %p1629_p9 = pneg %p1628_p7 }
  0x3b   : > { %p1636_p1 = pnand %p1635_p2, %p1629_p9 }
  0x3d   : > { %1639 = shalt.err (!%p1636_p1)
}
  0x3e   : > { %1508 = dma.hbm_to_vmem [thread:$0]  (!%p1868_p11), %s2215_s2, 1024, %s1872_s6, [#allocation6], %s1776_s15, %s1776_s15, %s1777_s16  }
  0x3f   : > { %s1927_s14 = sadd.s32 1, %s1772_s21   ;;  %s33_s29 = sadd.s32 1, %s1768_s20 }
  0x40   : > { %s30_s17 = ssub.s32 %s1772_s21, %s1927_s14  ;;  %p40_p13 = scmp.ne.s32.totalorder %s1768_s20, %s1764_s19 }
  0x41   : > { %p31_p6 = scmp.eq.s32.totalorder %s30_s17, 0  ;;  %p41_p10 = scmp.eq.s32.totalorder %s1772_s21, 0 }
  0x42   : > { %p2226_p3 = scmp.eq.s32.totalorder %s1838_s22, 1  ;;  %p1522_p7 = scmp.lt.s32.totalorder %s1772_s21, 2 }
  0x43   : > { %s1943_s27 = scalar_select %p31_p6, %s1768_s20, %s33_s29  }
  0x44   : > { %p1937_p5 = por %p2226_p3, %p40_p13  ;;  %p42_p9 = por %p41_p10, %p40_p13 }
  0x45   : > { %s214_s30 = sand.u32 1, %s1768_s20   ;;  %s1214_s6 = sshll.u32 %s1772_s21, 12 }
  0x46   : > { %s2227_s23 = scalar_select %p1937_p5, 1, 0 }
  0x47   : > { %s1148_s7 = sshll.u32 %s214_s30, 8  ;;  %s1950_s8 = scalar_lea.hbm %s2213_s0, %s1214_s6 }
  0x48   : > { %s218_s9 = scalar_lea.vmem [#allocation2], %s1148_s7  ;;  %p1954_p11 = pnand %p1522_p7, %p42_p9 }
  0x49   : > { %s225_s10 = sshll.u32 %s218_s9, 4  ;;  %s1958_s28 = scalar_lea.sflag [#allocation3], %s214_s30  ;;  %s1952_s10 = int_to_ptr.vmem [resolvable:$true] %s225_s10 }
  0x4a   : > { %s1640_s12 = scalar_lea.hbm %s1950_s8, 4096  ;;  %p1642_p0 = pneg %p1954_p11 }
  0x4b   : > { %p1641_p12 = scmp.ne.s32.totalorder %s1950_s8, %s1640_s12  ;;  %s1645_s17 = scalar_lea.hbm %s2213_s0, 8192 }
  0x4c   : > { %p1646_p13 = scmp.lt.u32.totalorder %s1950_s8, %s2213_s0  ;;  %p1647_p6 = scmp.lt.u32.totalorder %s1645_s17, %s1640_s12 }
  0x4d   : > { %p1643_p2 = pnand %p1642_p0, %p1641_p12  ;;  %p1649_p3 = scmp.lt.u32.totalorder %s1640_s12, %s1950_s8 }
  0x4e   : > { %p1648_p10 = por %p1647_p6, %p1646_p13 }
  0x4f   : > { %p1644_p1 = pneg %p1643_p2 }
  0x50   : > { %p1650_p7 = por %p1649_p3, %p1648_p10 }
  0x52   : > { %p1651_p9 = pnand %p1650_p7, %p1644_p1 }
  0x54   : > { %1654 = shalt.err (!%p1651_p9)
}
  0x55   : > { %s1655_s30 = scalar_lea.vmem %s1952_s10, 4096  ;;  %s1778_s15 = smov [#allocation2]  }
  0x56   : > { %p1656_p12 = scmp.ne.s32.totalorder %s1952_s10, %s1655_s30  ;;  %s1660_s16 = sshll.u32 %s1778_s15, 4  ;;  %s1661_s16 = int_to_ptr.vmem [resolvable:$false] %s1660_s16 }
  0x57   : > { %s1662_s9 = scalar_lea.vmem %s1661_s16, 8192  ;;  %p1663_p4 = scmp.lt.s32.totalorder %s1952_s10, %s1661_s16 }
  0x58   : > { %p1658_p2 = pnand %p1656_p12, %p1642_p0  ;;  %p1664_p13 = scmp.lt.s32.totalorder %s1662_s9, %s1655_s30 }
  0x5a   : > { %p1659_p5 = pneg %p1658_p2  ;;  %p1665_p6 = por %p1664_p13, %p1663_p4 }
  0x5c   : > { %p1666_p10 = pnand %p1665_p6, %p1659_p5 }
  0x5e   : > { %1669 = shalt.err (!%p1666_p10)
}
  0x5f   : > { %s1779_s12 = smov 128   ;;  %s1780_s13 = smov 8  }
  0x60   : > { %1512 = dma.hbm_to_vmem [thread:$0]  (!%p1954_p11), %s1950_s8, 4096, %s1952_s10, %s1958_s28, %s1779_s12, %s1779_s12, %s1780_s13  }
  0x61   : > { %237 = sbr.rel (%p1857_p8) target bundleno = 454 (0x1c6), region = 36  ;;  %s1989_s29 = sand.u32 (!%p1857_p8), 1, %s1764_s19  }
  0x62   : > { %s1152_s17 = sshll.u32 (!%p1857_p8), %s1989_s29, 8  ;;  %s240_s7 = scalar_lea.sflag (!%p1857_p8), [#allocation3], %s1989_s29 }
  0x63   : > { %s1995_s6 = scalar_lea.vmem (!%p1857_p8), [#allocation2], %s1152_s17  ;;  %p2229_p4 = scmp.ne.s32.totalorder (!%p1857_p8), %s2222_s24, 0 }
  0x68   : > { %1743 = dma.done.wait (%p2229_p4), %s240_s7, 4096  }
  0x69   : > { %1745 = vsyncadd (%p2229_p4), %s240_s7, 4294963200  ;;  %p2230_p5 = scmp.eq.s32.totalorder %s1838_s22, 0 }
  0x6b   : > { %1747 = dma.done.wait (%p2230_p5), [#allocation6], 2048   ;;  %p2231_p8 = pmov %p2230_p5 }
  0x6c   : > { %v1568_v0 = vld [vmem:[#allocation5] sm:$0xff]   ;;  %v1570_v2 = vld [vmem:[#allocation5 + $0x8] sm:$0xff]   ;;  %v1572_v4 = vld [vmem:[#allocation5 + $0x10] sm:$0xff]   ;;  %s1155_s8 = sshll.u32 %s1989_s29, 7  ;;  %s2047_s10 = scalar_lea.vmem [#allocation9], %s1152_s17 }
  0x6d   : > { %1749 = vsyncadd (%p2231_p8), [#allocation6], 4294965248  ;;  %v1569_v1 = vld [vmem:[#allocation7] sm:$0xff]   ;;  %1392 = vmatprep.subr.bf16.mxu0 %v1568_v0  ;;  %v1571_v3 = vld [vmem:[#allocation7 + $0x8] sm:$0xff]   ;;  %s2052_s11 = scalar_lea.vmem [#allocation8], %s1155_s8  ;;  %s1247_s28 = sshll.u32 %s1838_s22, 11 }
  0x6e   : > { %1440 = vmatprep.subr.bf16.mxu1 %v1569_v1  ;;  %1393 = vmatpush3.bf16.msra.mxu0 %v1568_v0  ;;  %v1573_v5 = vld [vmem:[#allocation7 + $0x10] sm:$0xff]   ;;  %v1574_v6 = vld [vmem:[#allocation5 + $0x18] sm:$0xff]   ;;  %v1576_v8 = vld [vmem:[#allocation5 + $0x20] sm:$0xff]   ;;  %s1003_s30 = sshll.u32 %s2052_s11, 4  ;;  %s2124_s9 = scalar_lea.hbm %s2217_s4, %s1247_s28  ;;  %s2129_s30 = int_to_ptr.vmem [resolvable:$true] %s1003_s30 }
  0x6f   : > { %1441 = vmatpush3.bf16.msra.mxu1 %v1569_v1  ;;  %1394 = vmatprep.subr.bf16.mxu0 %v1570_v2  ;;  %v1575_v7 = vld [vmem:[#allocation7 + $0x18] sm:$0xff]   ;;  %v1577_v9 = vld [vmem:[#allocation7 + $0x20] sm:$0xff]   ;;  %v1578_v10 = vld [vmem:[#allocation5 + $0x28] sm:$0xff]   ;;  %s1248_s12 = sshll.u32 %s1838_s22, 12  ;;  %s1019_s13 = sshll.u32 %s2047_s10, 4  ;;  %s2139_s13 = int_to_ptr.vmem [resolvable:$true] %s1019_s13 }
  0x70   : > { %1442 = vmatprep.subr.bf16.mxu1 %v1571_v3  ;;  %v287_v11 = vld [vmem:[%s1995_s6] sm:$0xff]  ;;  %v288_v12 = vld [vmem:[%s1995_s6 + $0x8] sm:$0xff]  ;;  %v1580_v15 = vld [vmem:[#allocation5 + $0x30] sm:$0xff]   ;;  %s2137_s7 = scalar_lea.hbm %s2218_s5, %s1248_s12  ;;  %s1670_s24 = scalar_lea.vmem %s2129_s30, 2048 }
  0x71   : > { %v1579_v13 = vld [vmem:[#allocation7 + $0x28] sm:$0xff]   ;;  %v319_v14 = vpack.c.bf16 %v288_v12, %v287_v11  ;;  %v1581_v16 = vld [vmem:[#allocation7 + $0x30] sm:$0xff]   ;;  %v1582_v17 = vld [vmem:[#allocation5 + $0x38] sm:$0xff]   ;;  %p1671_p11 = scmp.ne.s32.totalorder %s2129_s30, %s1670_s24  ;;  %p2232_p0 = scmp.ne.s32.totalorder %s2227_s23, 0 }
  0x72   : > { %1395 = vmatpush3.bf16.msra.mxu0 %v1570_v2  ;;  %v1583_v18 = vld [vmem:[#allocation7 + $0x38] sm:$0xff]   ;;  %v289_v19 = vld [vmem:[%s1995_s6 + $0x10] sm:$0xff]  ;;  %v291_v21 = vld [vmem:[%s1995_s6 + $0x20] sm:$0xff]  ;;  %s1781_s26 = smov [#allocation8]  }
  0x73   : > { %1443 = vmatpush3.bf16.msra.mxu1 %v1571_v3  ;;  %1396 = vmatprep.subr.bf16.mxu0 %v1572_v4  ;;  %v290_v20 = vld [vmem:[%s1995_s6 + $0x18] sm:$0xff]  ;;  %v292_v22 = vld [vmem:[%s1995_s6 + $0x28] sm:$0xff]  ;;  %v293_v25 = vld [vmem:[%s1995_s6 + $0x30] sm:$0xff]  ;;  %p1672_p1 = pnand %p1671_p11, %p2232_p0  ;;  %s1674_s8 = sshll.u32 %s1781_s26, 4  ;;  %s1675_s8 = int_to_ptr.vmem [resolvable:$false] %s1674_s8 }
  0x74   : > { %1444 = vmatprep.subr.bf16.mxu1 %v1573_v5  ;;  %1408 = vmatprep.mubr.bf16.mxu0 %v319_v14  ;;  %v320_v23 = vpack.c.bf16 %v290_v20, %v289_v19  ;;  %v321_v24 = vpack.c.bf16 %v292_v22, %v291_v21  ;;  %v294_v26 = vld [vmem:[%s1995_s6 + $0x38] sm:$0xff]  ;;  %v295_v27 = vld [vmem:[%s1995_s6 + $0x40] sm:$0xff]  ;;  %v296_v28 = vld [vmem:[%s1995_s6 + $0x48] sm:$0xff]  ;;  %s1676_s28 = scalar_lea.vmem %s1675_s8, 4096  ;;  %p1677_p7 = scmp.lt.s32.totalorder %s2129_s30, %s1675_s8 }
  0x75   : > { %1456 = vmatprep.mubr.bf16.mxu1 %v319_v14  ;;  %v322_v29 = vpack.c.bf16 %v294_v26, %v293_v25  ;;  %v323_v30 = vpack.c.bf16 %v296_v28, %v295_v27  ;;  %v297_v31 = vld [vmem:[%s1995_s6 + $0x50] sm:$0xff]  ;;  %v298_v32 = vld [vmem:[%s1995_s6 + $0x58] sm:$0xff]  ;;  %v299_v33 = vld [vmem:[%s1995_s6 + $0x60] sm:$0xff]  ;;  %p1673_p3 = pneg %p1672_p1  ;;  %p1678_p9 = scmp.lt.s32.totalorder %s1676_s28, %s1670_s24 }
  0x76   : > { %1397 = vmatpush3.bf16.msra.mxu0 %v1572_v4  ;;  %v300_v34 = vld [vmem:[%s1995_s6 + $0x68] sm:$0xff]  ;;  %v324_v35 = vpack.c.bf16 %v298_v32, %v297_v31  ;;  %v301_v37 = vld [vmem:[%s1995_s6 + $0x70] sm:$0xff]  ;;  %v302_v38 = vld [vmem:[%s1995_s6 + $0x78] sm:$0xff] }
  0x77   : > { %1445 = vmatpush3.bf16.msra.mxu1 %v1573_v5  ;;  %1398 = vmatprep.subr.bf16.mxu0 %v1574_v6  ;;  %v325_v36 = vpack.c.bf16 %v300_v34, %v299_v33  ;;  %v303_v39 = vld [vmem:[%s1995_s6 + $0x80] sm:$0xff]  ;;  %v304_v40 = vld [vmem:[%s1995_s6 + $0x88] sm:$0xff]  ;;  %v326_v41 = vpack.c.bf16 %v302_v38, %v301_v37  ;;  %v305_v43 = vld [vmem:[%s1995_s6 + $0x90] sm:$0xff]  ;;  %p1679_p12 = por %p1678_p9, %p1677_p7 }
  0x78   : > { %1446 = vmatprep.subr.bf16.mxu1 %v1575_v7  ;;  %v327_v42 = vpack.c.bf16 %v304_v40, %v303_v39  ;;  %v306_v44 = vld [vmem:[%s1995_s6 + $0x98] sm:$0xff]  ;;  %v307_v45 = vld [vmem:[%s1995_s6 + $0xa0] sm:$0xff]  ;;  %v308_v46 = vld [vmem:[%s1995_s6 + $0xa8] sm:$0xff] }
  0x79   : > { %v328_v47 = vpack.c.bf16 %v306_v44, %v305_v43  ;;  %v329_v48 = vpack.c.bf16 %v308_v46, %v307_v45  ;;  %v309_v49 = vld [vmem:[%s1995_s6 + $0xb0] sm:$0xff]  ;;  %v310_v50 = vld [vmem:[%s1995_s6 + $0xb8] sm:$0xff]  ;;  %v311_v51 = vld [vmem:[%s1995_s6 + $0xc0] sm:$0xff]  ;;  %p1680_p2 = pnand %p1679_p12, %p1673_p3 }
  0x7a   : > { %1399 = vmatpush3.bf16.msra.mxu0 %v1574_v6  ;;  %v312_v52 = vld [vmem:[%s1995_s6 + $0xc8] sm:$0xff]  ;;  %v330_v53 = vpack.c.bf16 %v310_v50, %v309_v49  ;;  %v313_v55 = vld [vmem:[%s1995_s6 + $0xd0] sm:$0xff]  ;;  %v314_v56 = vld [vmem:[%s1995_s6 + $0xd8] sm:$0xff] }
  0x7b   : > { %1447 = vmatpush3.bf16.msra.mxu1 %v1575_v7  ;;  %1400 = vmatprep.subr.bf16.mxu0 %v1576_v8  ;;  %v331_v54 = vpack.c.bf16 %v312_v52, %v311_v51  ;;  %v315_v57 = vld [vmem:[%s1995_s6 + $0xe0] sm:$0xff]  ;;  %v316_v58 = vld [vmem:[%s1995_s6 + $0xe8] sm:$0xff]  ;;  %v332_v59 = vpack.c.bf16 %v314_v56, %v313_v55  ;;  %v317_v61 = vld [vmem:[%s1995_s6 + $0xf0] sm:$0xff] }
  0x7c   : > { %1448 = vmatprep.subr.bf16.mxu1 %v1577_v9  ;;  %v333_v60 = vpack.c.bf16 %v316_v58, %v315_v57  ;;  %v318_v62 = vld [vmem:[%s1995_s6 + $0xf8] sm:$0xff]  ;;  %v2040_v0 = vld [vmem:[%s2216_s3] ss:$0 sm:$0xff]  ;;  %s985_s6 = scalar_lea.sflag [#allocation4], %s1989_s29 }
  0x7d   : > { %v334_v63 = vpack.c.bf16 %v318_v62, %v317_v61 }
  0x7e   : > { %1401 = vmatpush3.bf16.msra.mxu0 %v1576_v8 }
  0x7f   : > { %1449 = vmatpush3.bf16.msra.mxu1 %v1577_v9  ;;  %1402 = vmatprep.subr.bf16.mxu0 %v1578_v10 }
  0x80   : > { %1450 = vmatprep.subr.bf16.mxu1 %v1579_v13 }
  0x82   : > { %1403 = vmatpush3.bf16.msra.mxu0 %v1578_v10 }
  0x83   : > { %1451 = vmatpush3.bf16.msra.mxu1 %v1579_v13  ;;  %1404 = vmatprep.subr.bf16.mxu0 %v1580_v15 }
  0x84   : > { %1452 = vmatprep.subr.bf16.mxu1 %v1581_v16 }
  0x86   : > { %1405 = vmatpush3.bf16.msra.mxu0 %v1580_v15 }
  0x87   : > { %1453 = vmatpush3.bf16.msra.mxu1 %v1581_v16  ;;  %1406 = vmatprep.subr.bf16.mxu0 %v1582_v17 }
  0x88   : > { %1454 = vmatprep.subr.bf16.mxu1 %v1583_v18 }
  0x8a   : > { %1407 = vmatpush3.bf16.msra.mxu0 %v1582_v17 }
  0x8b   : > { %1455 = vmatpush3.bf16.msra.mxu1 %v1583_v18 }
  0x8d   : > { %1409 = vmatmul.mubr.bf16.vlgmr.msra.gmra.mrb[0].mxu0 %v320_v23 }
  0x8e   : > { %1457 = vmatmul.mubr.bf16.vlgmr.msra.gmra.mrb[0].mxu1 %v320_v23  ;;  %1412 = vmatprep.mubr.bf16.mxu0 %v321_v24 }
  0x8f   : > { %1460 = vmatprep.mubr.bf16.mxu1 %v321_v24 }
  0x95   : > { %1413 = vmatmul.mubr.bf16.gmra.mrb[4].mxu0 %v322_v29 }
  0x96   : > { %1461 = vmatmul.mubr.bf16.gmra.mrb[4].mxu1 %v322_v29  ;;  %1416 = vmatprep.mubr.bf16.mxu0 %v323_v30 }
  0x97   : > { %1464 = vmatprep.mubr.bf16.mxu1 %v323_v30 }
  0x9d   : > { %1417 = vmatmul.mubr.bf16.gmra.mrb[8].mxu0 %v324_v35 }
  0x9e   : > { %1465 = vmatmul.mubr.bf16.gmra.mrb[8].mxu1 %v324_v35  ;;  %1420 = vmatprep.mubr.bf16.mxu0 %v325_v36 }
  0x9f   : > { %1468 = vmatprep.mubr.bf16.mxu1 %v325_v36 }
  0xa5   : > { %1421 = vmatmul.mubr.bf16.gmra.mrb[12].mxu0 %v326_v41 }
  0xa6   : > { %1469 = vmatmul.mubr.bf16.gmra.mrb[12].mxu1 %v326_v41  ;;  %1424 = vmatprep.mubr.bf16.mxu0 %v327_v42 }
  0xa7   : > { %1472 = vmatprep.mubr.bf16.mxu1 %v327_v42 }
  0xad   : > { %1425 = vmatmul.mubr.bf16.gmra.mrb[16].mxu0 %v328_v47 }
  0xae   : > { %1473 = vmatmul.mubr.bf16.gmra.mrb[16].mxu1 %v328_v47  ;;  %1428 = vmatprep.mubr.bf16.mxu0 %v329_v48 }
  0xaf   : > { %1476 = vmatprep.mubr.bf16.mxu1 %v329_v48 }
  0xb5   : > { %1429 = vmatmul.mubr.bf16.gmra.mrb[20].mxu0 %v330_v53 }
  0xb6   : > { %1477 = vmatmul.mubr.bf16.gmra.mrb[20].mxu1 %v330_v53  ;;  %1432 = vmatprep.mubr.bf16.mxu0 %v331_v54 }
  0xb7   : > { %1480 = vmatprep.mubr.bf16.mxu1 %v331_v54 }
  0xbd   : > { %1433 = vmatmul.mubr.bf16.gmra.mrb[24].mxu0 %v332_v59 }
  0xbe   : > { %1481 = vmatmul.mubr.bf16.gmra.mrb[24].mxu1 %v332_v59  ;;  %1436 = vmatprep.mubr.bf16.mxu0 %v333_v60 }
  0xbf   : > { %1484 = vmatprep.mubr.bf16.mxu1 %v333_v60 }
  0xc5   : > { %1437 = vmatmul.mubr.bf16.gmra.mrb[28].mxu0 %v334_v63 }
  0xc6   : > { %1485 = vmatmul.mubr.bf16.gmra.mrb[28].mxu1 %v334_v63 }
 0x160   : > { %v1410_v1 = vpop.f32.mrb[0].mxu0 }
 0x161   : > { %v1458_v2 = vpop.f32.mrb[0].mxu1  ;;  %v433_v3 = vpop.f32.mrb[1].mxu0 }
 0x162   : > { %v674_v4 = vadd.f32 %v1458_v2, %v2040_v0  ;;  %v665_v5 = vpop.f32.mrb[1].mxu1  ;;  %v1411_v6 = vpop.f32.mrb[2].mxu0 }
 0x163   : > { %v666_v7 = vadd.f32 %v2040_v0, %v665_v5  ;;  %v1257_v8 = vpack.c.bf16 %v1411_v6, %v1410_v1  ;;  %v1459_v9 = vpop.f32.mrb[2].mxu1  ;;  %v436_v10 = vpop.f32.mrb[3].mxu0 }
 0x164   : > { %954 = vst [vmem:[%s2047_s10 + $0x10] sm:$0xff] %v674_v4  ;;  %v677_v11 = vadd.f32 %v1459_v9, %v2040_v0  ;;  %v1252_v12 = vpack.c.bf16 %v436_v10, %v433_v3  ;;  %v668_v13 = vpop.f32.mrb[3].mxu1 }
 0x165   : > { %952 = vst [vmem:[%s2047_s10] sm:$0xff] %v666_v7  ;;  %1329 = vst [vmem:[%s2052_s11 + $0x8] sm:$0xff] %v1257_v8   ;;  %v669_v14 = vadd.f32 %v2040_v0, %v668_v13 }
 0x166   : > { %955 = vst [vmem:[%s2047_s10 + $0x18] sm:$0xff] %v677_v11  ;;  %1253 = vst [vmem:[%s2052_s11] sm:$0xff] %v1252_v12  }
 0x167   : > { %953 = vst [vmem:[%s2047_s10 + $0x8] sm:$0xff] %v669_v14 }
 0x168   : > { %v1414_v15 = vpop.f32.mrb[4].mxu0 }
 0x169   : > { %v1462_v16 = vpop.f32.mrb[4].mxu1  ;;  %v449_v17 = vpop.f32.mrb[5].mxu0 }
 0x16a   : > { %v690_v18 = vadd.f32 %v1462_v16, %v2040_v0  ;;  %v681_v19 = vpop.f32.mrb[5].mxu1  ;;  %v1415_v20 = vpop.f32.mrb[6].mxu0 }
 0x16b   : > { %v682_v21 = vadd.f32 %v2040_v0, %v681_v19  ;;  %v1267_v22 = vpack.c.bf16 %v1415_v20, %v1414_v15  ;;  %v1463_v23 = vpop.f32.mrb[6].mxu1  ;;  %v452_v24 = vpop.f32.mrb[7].mxu0 }
 0x16c   : > { %958 = vst [vmem:[%s2047_s10 + $0x30] sm:$0xff] %v690_v18  ;;  %v693_v25 = vadd.f32 %v1463_v23, %v2040_v0  ;;  %v1262_v26 = vpack.c.bf16 %v452_v24, %v449_v17  ;;  %v684_v27 = vpop.f32.mrb[7].mxu1 }
 0x16d   : > { %956 = vst [vmem:[%s2047_s10 + $0x20] sm:$0xff] %v682_v21  ;;  %1331 = vst [vmem:[%s2052_s11 + $0x18] sm:$0xff] %v1267_v22   ;;  %v685_v28 = vadd.f32 %v2040_v0, %v684_v27 }
 0x16e   : > { %959 = vst [vmem:[%s2047_s10 + $0x38] sm:$0xff] %v693_v25  ;;  %1330 = vst [vmem:[%s2052_s11 + $0x10] sm:$0xff] %v1262_v26  }
 0x16f   : > { %957 = vst [vmem:[%s2047_s10 + $0x28] sm:$0xff] %v685_v28 }
 0x170   : > { %v1418_v29 = vpop.f32.mrb[8].mxu0 }
 0x171   : > { %v1466_v30 = vpop.f32.mrb[8].mxu1  ;;  %v465_v31 = vpop.f32.mrb[9].mxu0 }
 0x172   : > { %v706_v32 = vadd.f32 %v1466_v30, %v2040_v0  ;;  %v697_v33 = vpop.f32.mrb[9].mxu1  ;;  %v1419_v34 = vpop.f32.mrb[10].mxu0 }
 0x173   : > { %v698_v35 = vadd.f32 %v2040_v0, %v697_v33  ;;  %v1277_v36 = vpack.c.bf16 %v1419_v34, %v1418_v29  ;;  %v1467_v37 = vpop.f32.mrb[10].mxu1  ;;  %v468_v38 = vpop.f32.mrb[11].mxu0 }
 0x174   : > { %962 = vst [vmem:[%s2047_s10 + $0x50] sm:$0xff] %v706_v32  ;;  %v709_v39 = vadd.f32 %v1467_v37, %v2040_v0  ;;  %v1272_v40 = vpack.c.bf16 %v468_v38, %v465_v31  ;;  %v700_v41 = vpop.f32.mrb[11].mxu1 }
 0x175   : > { %960 = vst [vmem:[%s2047_s10 + $0x40] sm:$0xff] %v698_v35  ;;  %1333 = vst [vmem:[%s2052_s11 + $0x28] sm:$0xff] %v1277_v36   ;;  %v701_v42 = vadd.f32 %v2040_v0, %v700_v41 }
 0x176   : > { %963 = vst [vmem:[%s2047_s10 + $0x58] sm:$0xff] %v709_v39  ;;  %1332 = vst [vmem:[%s2052_s11 + $0x20] sm:$0xff] %v1272_v40  }
 0x177   : > { %961 = vst [vmem:[%s2047_s10 + $0x48] sm:$0xff] %v701_v42 }
 0x178   : > { %v1422_v43 = vpop.f32.mrb[12].mxu0 }
 0x179   : > { %v1470_v44 = vpop.f32.mrb[12].mxu1  ;;  %v481_v45 = vpop.f32.mrb[13].mxu0 }
 0x17a   : > { %v722_v46 = vadd.f32 %v1470_v44, %v2040_v0  ;;  %v713_v47 = vpop.f32.mrb[13].mxu1  ;;  %v1423_v48 = vpop.f32.mrb[14].mxu0 }
 0x17b   : > { %v714_v49 = vadd.f32 %v2040_v0, %v713_v47  ;;  %v1287_v50 = vpack.c.bf16 %v1423_v48, %v1422_v43  ;;  %v1471_v51 = vpop.f32.mrb[14].mxu1  ;;  %v484_v52 = vpop.f32.mrb[15].mxu0 }
 0x17c   : > { %966 = vst [vmem:[%s2047_s10 + $0x70] sm:$0xff] %v722_v46  ;;  %v725_v53 = vadd.f32 %v1471_v51, %v2040_v0  ;;  %v1282_v54 = vpack.c.bf16 %v484_v52, %v481_v45  ;;  %v716_v55 = vpop.f32.mrb[15].mxu1 }
 0x17d   : > { %964 = vst [vmem:[%s2047_s10 + $0x60] sm:$0xff] %v714_v49  ;;  %1335 = vst [vmem:[%s2052_s11 + $0x38] sm:$0xff] %v1287_v50   ;;  %v717_v56 = vadd.f32 %v2040_v0, %v716_v55 }
 0x17e   : > { %967 = vst [vmem:[%s2047_s10 + $0x78] sm:$0xff] %v725_v53  ;;  %1334 = vst [vmem:[%s2052_s11 + $0x30] sm:$0xff] %v1282_v54  }
 0x17f   : > { %965 = vst [vmem:[%s2047_s10 + $0x68] sm:$0xff] %v717_v56 }
 0x180   : > { %v1426_v57 = vpop.f32.mrb[16].mxu0 }
 0x181   : > { %v1474_v58 = vpop.f32.mrb[16].mxu1  ;;  %v497_v59 = vpop.f32.mrb[17].mxu0 }
 0x182   : > { %v738_v60 = vadd.f32 %v1474_v58, %v2040_v0  ;;  %v729_v61 = vpop.f32.mrb[17].mxu1  ;;  %v1427_v62 = vpop.f32.mrb[18].mxu0 }
 0x183   : > { %v730_v63 = vadd.f32 %v2040_v0, %v729_v61  ;;  %v1297_v1 = vpack.c.bf16 %v1427_v62, %v1426_v57  ;;  %v1475_v2 = vpop.f32.mrb[18].mxu1  ;;  %v500_v3 = vpop.f32.mrb[19].mxu0 }
 0x184   : > { %970 = vst [vmem:[%s2047_s10 + $0x90] sm:$0xff] %v738_v60  ;;  %v741_v4 = vadd.f32 %v1475_v2, %v2040_v0  ;;  %v1292_v5 = vpack.c.bf16 %v500_v3, %v497_v59  ;;  %v732_v6 = vpop.f32.mrb[19].mxu1 }
 0x185   : > { %968 = vst [vmem:[%s2047_s10 + $0x80] sm:$0xff] %v730_v63  ;;  %1337 = vst [vmem:[%s2052_s11 + $0x48] sm:$0xff] %v1297_v1   ;;  %v733_v7 = vadd.f32 %v2040_v0, %v732_v6 }
 0x186   : > { %971 = vst [vmem:[%s2047_s10 + $0x98] sm:$0xff] %v741_v4  ;;  %1336 = vst [vmem:[%s2052_s11 + $0x40] sm:$0xff] %v1292_v5  }
 0x187   : > { %969 = vst [vmem:[%s2047_s10 + $0x88] sm:$0xff] %v733_v7 }
 0x188   : > { %v1430_v8 = vpop.f32.mrb[20].mxu0 }
 0x189   : > { %v1478_v9 = vpop.f32.mrb[20].mxu1  ;;  %v513_v10 = vpop.f32.mrb[21].mxu0 }
 0x18a   : > { %v754_v11 = vadd.f32 %v1478_v9, %v2040_v0  ;;  %v745_v12 = vpop.f32.mrb[21].mxu1  ;;  %v1431_v13 = vpop.f32.mrb[22].mxu0 }
 0x18b   : > { %v746_v14 = vadd.f32 %v2040_v0, %v745_v12  ;;  %v1307_v15 = vpack.c.bf16 %v1431_v13, %v1430_v8  ;;  %v1479_v16 = vpop.f32.mrb[22].mxu1  ;;  %v516_v17 = vpop.f32.mrb[23].mxu0 }
 0x18c   : > { %974 = vst [vmem:[%s2047_s10 + $0xb0] sm:$0xff] %v754_v11  ;;  %v757_v18 = vadd.f32 %v1479_v16, %v2040_v0  ;;  %v1302_v19 = vpack.c.bf16 %v516_v17, %v513_v10  ;;  %v748_v20 = vpop.f32.mrb[23].mxu1 }
 0x18d   : > { %972 = vst [vmem:[%s2047_s10 + $0xa0] sm:$0xff] %v746_v14  ;;  %1339 = vst [vmem:[%s2052_s11 + $0x58] sm:$0xff] %v1307_v15   ;;  %v749_v21 = vadd.f32 %v2040_v0, %v748_v20 }
 0x18e   : > { %975 = vst [vmem:[%s2047_s10 + $0xb8] sm:$0xff] %v757_v18  ;;  %1338 = vst [vmem:[%s2052_s11 + $0x50] sm:$0xff] %v1302_v19  }
 0x18f   : > { %973 = vst [vmem:[%s2047_s10 + $0xa8] sm:$0xff] %v749_v21 }
 0x190   : > { %v1434_v22 = vpop.f32.mrb[24].mxu0 }
 0x191   : > { %v1482_v23 = vpop.f32.mrb[24].mxu1  ;;  %v529_v24 = vpop.f32.mrb[25].mxu0 }
 0x192   : > { %v770_v25 = vadd.f32 %v1482_v23, %v2040_v0  ;;  %v761_v26 = vpop.f32.mrb[25].mxu1  ;;  %v1435_v27 = vpop.f32.mrb[26].mxu0 }
 0x193   : > { %v762_v28 = vadd.f32 %v2040_v0, %v761_v26  ;;  %v1317_v29 = vpack.c.bf16 %v1435_v27, %v1434_v22  ;;  %v1483_v30 = vpop.f32.mrb[26].mxu1  ;;  %v532_v31 = vpop.f32.mrb[27].mxu0 }
 0x194   : > { %978 = vst [vmem:[%s2047_s10 + $0xd0] sm:$0xff] %v770_v25  ;;  %v773_v32 = vadd.f32 %v1483_v30, %v2040_v0  ;;  %v1312_v33 = vpack.c.bf16 %v532_v31, %v529_v24  ;;  %v764_v34 = vpop.f32.mrb[27].mxu1 }
 0x195   : > { %976 = vst [vmem:[%s2047_s10 + $0xc0] sm:$0xff] %v762_v28  ;;  %1341 = vst [vmem:[%s2052_s11 + $0x68] sm:$0xff] %v1317_v29   ;;  %v765_v35 = vadd.f32 %v2040_v0, %v764_v34 }
 0x196   : > { %979 = vst [vmem:[%s2047_s10 + $0xd8] sm:$0xff] %v773_v32  ;;  %1340 = vst [vmem:[%s2052_s11 + $0x60] sm:$0xff] %v1312_v33  }
 0x197   : > { %977 = vst [vmem:[%s2047_s10 + $0xc8] sm:$0xff] %v765_v35 }
 0x198   : > { %v1438_v36 = vpop.f32.mrb[28].mxu0 }
 0x199   : > { %v1486_v37 = vpop.f32.mrb[28].mxu1  ;;  %v545_v38 = vpop.f32.mrb[29].mxu0 }
 0x19a   : > { %v786_v39 = vadd.f32 %v1486_v37, %v2040_v0  ;;  %v777_v40 = vpop.f32.mrb[29].mxu1  ;;  %v1439_v41 = vpop.f32.mrb[30].mxu0 }
 0x19b   : > { %v778_v42 = vadd.f32 %v2040_v0, %v777_v40  ;;  %v1327_v43 = vpack.c.bf16 %v1439_v41, %v1438_v36  ;;  %v1487_v44 = vpop.f32.mrb[30].mxu1  ;;  %v548_v45 = vpop.f32.mrb[31].mxu0 }
 0x19c   : > { %982 = vst [vmem:[%s2047_s10 + $0xf0] sm:$0xff] %v786_v39  ;;  %v789_v46 = vadd.f32 %v1487_v44, %v2040_v0  ;;  %v1322_v47 = vpack.c.bf16 %v548_v45, %v545_v38  ;;  %v780_v48 = vpop.f32.mrb[31].mxu1 }
 0x19d   : > { %980 = vst [vmem:[%s2047_s10 + $0xe0] sm:$0xff] %v778_v42  ;;  %1343 = vst [vmem:[%s2052_s11 + $0x78] sm:$0xff] %v1327_v43   ;;  %v781_v49 = vadd.f32 %v2040_v0, %v780_v48 }
 0x19e   : > { %983 = vst [vmem:[%s2047_s10 + $0xf8] sm:$0xff] %v789_v46  ;;  %1342 = vst [vmem:[%s2052_s11 + $0x70] sm:$0xff] %v1322_v47  }
 0x19f   : > { %981 = vst [vmem:[%s2047_s10 + $0xe8] sm:$0xff] %v781_v49 }
 0x1a0   : > { %1683 = shalt.err (!%p1680_p2)
}
 0x1a1   : > { %s1684_s10 = scalar_lea.hbm %s2124_s9, 2048  ;;  %s1688_s16 = scalar_lea.hbm %s2217_s4, 4096 }
 0x1a2   : > { %p1685_p13 = scmp.ne.s32.totalorder %s2124_s9, %s1684_s10  ;;  %p1689_p4 = scmp.lt.u32.totalorder %s2124_s9, %s2217_s4 }
 0x1a3   : > { %p1690_p5 = scmp.lt.u32.totalorder %s1688_s16, %s1684_s10  ;;  %p1692_p11 = scmp.lt.u32.totalorder %s1684_s10, %s2124_s9 }
 0x1a4   : > { %p1686_p6 = pnand %p1685_p13, %p2232_p0 }
 0x1a5   : > { %p1691_p8 = por %p1690_p5, %p1689_p4 }
 0x1a6   : > { %p1687_p10 = pneg %p1686_p6 }
 0x1a7   : > { %p1693_p1 = por %p1692_p11, %p1691_p8 }
 0x1a9   : > { %p1694_p3 = pnand %p1693_p1, %p1687_p10 }
 0x1ab   : > { %1697 = shalt.err (!%p1694_p3)
}
 0x1ac   : > { %s1782_s17 = smov 64   ;;  %s1783_s24 = smov 4  }
 0x1ad   : > { %1498 = dma.vmem_to_hbm [thread:$0]  (%p2232_p0), %s2129_s30, 2048, %s2124_s9, %s985_s6, %s1782_s17, %s1782_s17, %s1783_s24  }
 0x1ae   : > { %s990_s26 = scalar_lea.sflag [#allocation10], %s1989_s29  ;;  %s1698_s8 = scalar_lea.vmem %s2139_s13, 4096 }
 0x1af   : > { %p1699_p7 = scmp.ne.s32.totalorder %s2139_s13, %s1698_s8  ;;  %s1784_s28 = smov [#allocation9]  }
 0x1b0   : > { %s1702_s10 = sshll.u32 %s1784_s28, 4  ;;  %s1703_s10 = int_to_ptr.vmem [resolvable:$false] %s1702_s10 }
 0x1b1   : > { %p1700_p9 = pnand %p1699_p7, %p2232_p0  ;;  %s1704_s11 = scalar_lea.vmem %s1703_s10, 8192 }
 0x1b2   : > { %p1705_p2 = scmp.lt.s32.totalorder %s2139_s13, %s1703_s10  ;;  %p1706_p13 = scmp.lt.s32.totalorder %s1704_s11, %s1698_s8 }
 0x1b3   : > { %p1701_p12 = pneg %p1700_p9 }
 0x1b4   : > { %p1707_p6 = por %p1706_p13, %p1705_p2 }
 0x1b6   : > { %p1708_p10 = pnand %p1707_p6, %p1701_p12 }
 0x1b8   : > { %1711 = shalt.err (!%p1708_p10)
}
 0x1b9   : > { %s1712_s30 = scalar_lea.hbm %s2137_s7, 4096  ;;  %s1716_s15 = scalar_lea.hbm %s2218_s5, 8192 }
 0x1ba   : > { %p1713_p4 = scmp.ne.s32.totalorder %s2137_s7, %s1712_s30  ;;  %p1717_p11 = scmp.lt.u32.totalorder %s2137_s7, %s2218_s5 }
 0x1bb   : > { %p1718_p1 = scmp.lt.u32.totalorder %s1716_s15, %s1712_s30  ;;  %p1720_p7 = scmp.lt.u32.totalorder %s1712_s30, %s2137_s7 }
 0x1bc   : > { %p1714_p5 = pnand %p1713_p4, %p2232_p0 }
 0x1bd   : > { %p1719_p3 = por %p1718_p1, %p1717_p11 }
 0x1be   : > { %p1715_p8 = pneg %p1714_p5 }
 0x1bf   : > { %p1721_p9 = por %p1720_p7, %p1719_p3 }
 0x1c1   : > { %p1722_p12 = pnand %p1721_p9, %p1715_p8 }
 0x1c3   : > { %1725 = shalt.err (!%p1722_p12)
}
 0x1c4   : > { %s1785_s22 = smov 128   ;;  %s1786_s17 = smov 8  }
 0x1c5   : > { %1499 = dma.vmem_to_hbm [thread:$0]  (%p2232_p0), %s2139_s13, 4096, %s2137_s7, %s990_s26, %s1785_s22, %s1785_s22, %s1786_s17  }
 0x1c6 PF: > { %s1034_s24 = sand.u32 1, %s1760_s18   ;;  %p2233_p2 = scmp.ne.s32.totalorder %s2223_s25, 0 }
 0x1c7   : > { %p2234_p13 = scmp.ge.s32.totalorder %s1772_s21, 2  ;;  %s1035_s8 = scalar_lea.sflag [#allocation4], %s1034_s24 }
 0x1c9   : > { %p1514_p6 = pnand %p2234_p13, %p2233_p2 }
 0x1cb   : > { %1751 = dma.done.wait (!%p1514_p6), %s1035_s8, 2048  }
 0x1cc   : > { %1753 = vsyncadd (!%p1514_p6), %s1035_s8, 4294965248  ;;  %s1044_s28 = scalar_lea.sflag [#allocation10], %s1034_s24 }
 0x1cd   : > { %1755 = dma.done.wait (!%p1514_p6), %s1044_s28, 4096  }
 0x1ce   : > { %1757 = vsyncadd (!%p1514_p6), %s1044_s28, 4294963200  ;;  %p23_p0 = scmp.ge.s32.totalorder %s1927_s14, 4   ;;  %s2235_s18 = smov %s1764_s19 }
 0x1cf   : > { %s2236_s19 = smov %s1768_s20  ;;  %s2237_s20 = smov %s1943_s27 }
 0x1d0   : > { %s2238_s21 = smov %s1927_s14  ;;  %25 = sbr.rel (!%p23_p0) target bundleno = 8 (0x8), region = 106 }
 0x1d7   :  { %1049 = vsyncpa [#allocation3], 1 }
 0x1d8   :  { %1051 = vsyncpa [#allocation3 + $0x1], 1 }
 0x1d9   :  { %1052 = vsyncpa [#allocation6], 1 }
 0x1da   :  { %1053 = vsyncpa [#allocation4], 1 }
 0x1db   :  { %1055 = vsyncpa [#allocation4 + $0x1], 1 }
 0x1dc   :  { %1056 = vsyncpa [#allocation10], 1 }
 0x1dd   :  { %1058 = vsyncpa [#allocation10 + $0x1], 1 }

</bundles_post_ra>
